<compile_context>
chip_gen: v6e
topology: v6e:2x2x1
jax: 0.10.0
libtpu: 0.0.40
codegen_flags: <defaults>
</compile_context>

<pallas_src>
import math

import jax
import jax.numpy as jnp
from jax.experimental import pallas as pl
from jax.experimental.pallas import tpu as pltpu


def _shift_scale_kernel(y_ref, m_ref, inv_s_ref, z_ref):
    # y_ref:     (TR, L) tile of rows
    # m_ref:     (1, L)  per-lane shift     (broadcast over sublanes)
    # inv_s_ref: (1, L)  per-lane 1/scale   (broadcast over sublanes)
    # z_ref:     (TR, L) output: (y - m) * inv_s
    z_ref[...] = (y_ref[...] - m_ref[...]) * inv_s_ref[...]


def shift_scale_forward(y, m, s, *, row_tile=None):
    """Pallas implementation of ShiftScaleLayer.forward(y) with dim_idx=None.

    Args:
      y: (B, T, D) float array.
      m: (D,) per-feature shift.
      s: (D,) per-feature scale (zeros already patched to 1.0).
      row_tile: optional override for the number of (lane-folded) rows per tile.
    Returns:
      (z, neg_log_s_expanded), both of shape (B, T, D).
    """
    B, T, D = y.shape
    out_dtype = y.dtype
    itemsize = jnp.dtype(out_dtype).itemsize

    # -log(s): D values computed once in the wrapper; full-shape result is an
    # XLA broadcast, not a kernel output stream.
    neg_log_s = (-jnp.log(s.astype(jnp.float32))).astype(out_dtype)
    neg_log_s_expanded = jnp.broadcast_to(neg_log_s[None, None, :], y.shape)

    # Exact per-feature reciprocal computed once (kernel body stays sub+mul).
    inv_s = (1.0 / s.astype(jnp.float32)).astype(out_dtype)
    m_c = m.astype(out_dtype)

    R = B * T
    y2 = y.reshape(R, D)

    # ---- lane-dense folding of the feature dim (no padding copies) ----------
    L = math.lcm(D, 128)
    fold = L // D
    if fold > 1 and (L > 2048 or R % fold != 0):
        # TODO(synk): ragged/awkward D keeps the full-D (masked-store) path
        # rather than paying a full pad copy of y in HBM.
        fold, L = 1, D
    rows = R // fold
    y_v = y2.reshape(rows, L)                    # free reshape, no copy
    m_v = jnp.tile(m_c, fold).reshape(1, L)
    inv_s_v = jnp.tile(inv_s, fold).reshape(1, L)

    # ---- row tiling (VMEM-budgeted, sublane-aligned, ragged last block) -----
    sublane = max(8, 32 // itemsize)             # 8 for f32, 16 for bf16
    if row_tile is None:
        # ~8 MiB for double-buffered input + output tiles (4 live buffers):
        # fits v5e's 16 MiB scoped-VMEM default with headroom.
        budget = 8 * 1024 * 1024
        row_tile = budget // (4 * L * itemsize)
    row_tile = max(sublane, (row_tile // sublane) * sublane)
    if row_tile >= rows:
        row_tile = rows                          # single full-extent block (always legal)
    grid = (pl.cdiv(rows, row_tile),)

    z_v = pl.pallas_call(
        _shift_scale_kernel,
        out_shape=jax.ShapeDtypeStruct((rows, L), out_dtype),
        grid=grid,
        in_specs=[
            pl.BlockSpec((row_tile, L), lambda i: (i, 0)),
            pl.BlockSpec((1, L), lambda i: (0, 0)),
            pl.BlockSpec((1, L), lambda i: (0, 0)),
        ],
        out_specs=pl.BlockSpec((row_tile, L), lambda i: (i, 0)),
        compiler_params=pltpu.CompilerParams(
            dimension_semantics=("parallel",),
        ),
    )(y_v, m_v, inv_s_v)

    z = z_v.reshape(B, T, D)                     # free reshape, no copy
    return z, neg_log_s_expanded


def make_shift_scale_params(m, s):
    """Replicates ShiftScaleLayer.__init__ buffer setup (zero-std patching).

    Traceable (no host sync): zeros in s are patched to 1.0 only if any entry
    of s is > 0, matching the PyTorch guard. If ALL entries are zero the patch
    is skipped (intentional parity; downstream sees inf/nan, as in torch).
    """
    m = jnp.asarray(m, dtype=jnp.float32)
    s = jnp.asarray(s, dtype=jnp.float32)
    any_pos = jnp.any(s > 0)
    s = jnp.where((s == 0) & any_pos, jnp.float32(1.0), s)
    return m, s


if __name__ == "__main__":
    key = jax.random.PRNGKey(0)
    B, T, D = 2, 8, 32  # batch, seq, hidden

    ky, km, ks = jax.random.split(key, 3)
    y = jax.random.normal(ky, (B, T, D), dtype=jnp.float32)
    m_raw = jax.random.normal(km, (D,), dtype=jnp.float32)
    # deterministic positive stds, with one zero entry to exercise the patch
    s_raw = jnp.abs(jax.random.normal(ks, (D,), dtype=jnp.float32)) + 0.5
    s_raw = s_raw.at[3].set(0.0)

    m, s = make_shift_scale_params(m_raw, s_raw)

    # Folded (lane-dense) path: B*T divisible by 128/D.
    z, neg_log_s = shift_scale_forward(y, m, s)
    z = jax.block_until_ready(z)
    neg_log_s = jax.block_until_ready(neg_log_s)

    z_ref = (y - m[None, None, :]) / s[None, None, :]
    nls_ref = jnp.broadcast_to(-jnp.log(s)[None, None, :], y.shape)
    assert jnp.allclose(z, z_ref, atol=1e-5, rtol=1e-5)
    assert jnp.allclose(neg_log_s, nls_ref, atol=1e-5, rtol=1e-5)

    # Unfolded fallback path (row count not divisible by the lane fold).
    y_odd = y[:, :7, :]
    z2, nls2 = shift_scale_forward(y_odd, m, s)
    z2 = jax.block_until_ready(z2)
    z2_ref = (y_odd - m[None, None, :]) / s[None, None, :]
    nls2_ref = jnp.broadcast_to(-jnp.log(s)[None, None, :], y_odd.shape)
    assert jnp.allclose(z2, z2_ref, atol=1e-5, rtol=1e-5)
    assert jnp.allclose(nls2, nls2_ref, atol=1e-5, rtol=1e-5)

    print("KERNEL_OK")
</pallas_src>

<mosaic_0001>
module attributes {stable_mosaic.version = 11 : i64} {
  func.func @_shift_scale_kernel(%arg0: i32, %arg1: memref<4x128xf32, #tpu.memory_space<vmem>>, %arg2: memref<1x128xf32, #tpu.memory_space<vmem>>, %arg3: memref<1x128xf32, #tpu.memory_space<vmem>>, %arg4: memref<4x128xf32, #tpu.memory_space<vmem>>) attributes {dimension_semantics = [#tpu.dimension_semantics<parallel>], iteration_bounds = array<i64: 1>, scalar_prefetch = 0 : i64, scratch_operands = 0 : i64, tpu.core_type = #tpu.core_type<tc>, window_params = [{transform_indices = @transform_0, window_bounds = array<i64: 4, 128>}, {pipeline_mode = #tpu.pipeline_mode<synchronous>, transform_indices = @transform_1, window_bounds = array<i64: 1, 128>}, {pipeline_mode = #tpu.pipeline_mode<synchronous>, transform_indices = @transform_2, window_bounds = array<i64: 1, 128>}, {transform_indices = @transform_3, window_bounds = array<i64: 4, 128>}]} {
    %c0 = arith.constant 0 : index
    %c0_0 = arith.constant 0 : index
    %0 = vector.load %arg1[%c0, %c0_0] : memref<4x128xf32, #tpu.memory_space<vmem>>, vector<4x128xf32>
    %c0_1 = arith.constant 0 : index
    %c0_2 = arith.constant 0 : index
    %1 = vector.load %arg2[%c0_1, %c0_2] : memref<1x128xf32, #tpu.memory_space<vmem>>, vector<1x128xf32>
    %2 = vector.broadcast %1 : vector<1x128xf32> to vector<4x128xf32>
    %3 = arith.subf %0, %2 : vector<4x128xf32>
    %c0_3 = arith.constant 0 : index
    %c0_4 = arith.constant 0 : index
    %4 = vector.load %arg3[%c0_3, %c0_4] : memref<1x128xf32, #tpu.memory_space<vmem>>, vector<1x128xf32>
    %5 = vector.broadcast %4 : vector<1x128xf32> to vector<4x128xf32>
    %6 = arith.mulf %3, %5 : vector<4x128xf32>
    %c0_5 = arith.constant 0 : index
    %c0_6 = arith.constant 0 : index
    %7 = vector.load %arg4[%c0_5, %c0_6] : memref<4x128xf32, #tpu.memory_space<vmem>>, vector<4x128xf32>
    tpu.vector_store %arg4[%c0_5, %c0_6], %6 {strides = array<i32>} : memref<4x128xf32, #tpu.memory_space<vmem>>, vector<4x128xf32>,
    return
  }
  func.func @transform_0(%arg0: i32) -> (i32, i32) {
    %c0_i32 = arith.constant 0 : i32
    %c0_i32_0 = arith.constant 0 : i32
    return %arg0, %c0_i32 : i32, i32
  }
  func.func @transform_1(%arg0: i32) -> (i32, i32) {
    %c0_i32 = arith.constant 0 : i32
    %c0_i32_0 = arith.constant 0 : i32
    %c0_i32_1 = arith.constant 0 : i32
    return %c0_i32, %c0_i32_0 : i32, i32
  }
  func.func @transform_2(%arg0: i32) -> (i32, i32) {
    %c0_i32 = arith.constant 0 : i32
    %c0_i32_0 = arith.constant 0 : i32
    %c0_i32_1 = arith.constant 0 : i32
    return %c0_i32, %c0_i32_0 : i32, i32
  }
  func.func @transform_3(%arg0: i32) -> (i32, i32) {
    %c0_i32 = arith.constant 0 : i32
    %c0_i32_0 = arith.constant 0 : i32
    return %arg0, %c0_i32 : i32, i32
  }
}

</mosaic_0001>

<bundles_post_ra>
// kernel: tpu_custom_call.1
= control target key start
LH: loop header
LB: loop body
LE: loop exit
PB: predicated region body
PF: predicated region fallthrough
CT: control target
= control target key end

     0   :  { %8 = vsyncpa [#allocation3], 0  ;;  %s142_s0 = inlined_call_operand.hbm [shape: f32[4,128], index: 0, kind: input, shape index: {}]   ;;  %s143_s1 = inlined_call_operand.vmem [shape: f32[1,128], index: 1, kind: input, shape index: {}]   ;;  %s144_s2 = inlined_call_operand.vmem [shape: f32[1,128], index: 2, kind: input, shape index: {}]   ;;  %s145_s3 = inlined_call_operand.hbm [shape: f32[4,128], index: 3, kind: output, shape index: {}]  }
   0x1   :  { %9 = vsyncpa [#allocation4], 0  ;;  %s108_s12 = smov [#allocation2]  }
   0x2   :  { %s16_s13 = sshll.u32 %s108_s12, 4  ;;  %s17_s13 = int_to_ptr.vmem [resolvable:$true] %s16_s13 }
   0x3   :  { %s72_s14 = scalar_lea.vmem %s17_s13, 64  ;;  %p77_p1 = scmp.lt.s32.totalorder %s17_s13, %s17_s13 }
   0x4   :  { %p73_p0 = scmp.ne.s32.totalorder %s17_s13, %s72_s14  ;;  %p78_p2 = scmp.lt.s32.totalorder %s72_s14, %s72_s14 }
   0x6   :  { %p79_p3 = por %p78_p2, %p77_p1 }
   0x8   :  { %p80_p4 = pnand %p79_p3, %p73_p0 }
   0xa   :  { %83 = shalt.err (!%p80_p4)
}
   0xb   :  { %19 = dma.hbm_to_vmem [thread:$0]  %s142_s0, 64, %s17_s13, [#allocation3]  }
   0xc   :  { %104 = dma.done.wait [#allocation3], 64  }
   0xd   :  { %105 = vsyncadd [#allocation3], 4294967232  ;;  %s109_s17 = smov [#allocation5]   ;;  %v27_v0 = vld [vmem:[#allocation2] sm:$0xf] }
   0xe   :  { %s51_s18 = sshll.u32 %s109_s17, 4  ;;  %v60_v1 = vld [vmem:[%s143_s1] ss:$0 sm:$0xff]  ;;  %s52_s18 = int_to_ptr.vmem [resolvable:$true] %s51_s18 }
   0xf   :  { %v61_v2 = vld [vmem:[%s144_s2] ss:$0 sm:$0xff]  ;;  %v35_v3 = vsub.f32 %v27_v0, %v60_v1  ;;  %s84_s23 = scalar_lea.vmem %s52_s18, 64  ;;  %p89_p6 = scmp.lt.s32.totalorder %s52_s18, %s52_s18 }
  0x10   :  { %p85_p5 = scmp.ne.s32.totalorder %s52_s18, %s84_s23  ;;  %p90_p7 = scmp.lt.s32.totalorder %s84_s23, %s84_s23 }
  0x11   :  { %v43_v4 = vmul.f32 %v61_v2, %v35_v3 }
  0x12   :  { %p91_p8 = por %p90_p7, %p89_p6 }
  0x13   :  { %44 = vst [vmem:[#allocation5] sm:$0xf] %v43_v4 }
  0x14   :  { %p92_p9 = pnand %p91_p8, %p85_p5 }
  0x16   :  { %95 = shalt.err (!%p92_p9)
}
  0x17   :  { %54 = dma.vmem_to_hbm [thread:$0]  %s52_s18, 64, %s145_s3, [#allocation4]  }
  0x18   :  { %106 = dma.done.wait [#allocation4], 64  }
  0x19   :  { %107 = vsyncadd [#allocation4], 4294967232 }
  0x1a   :  { %58 = vsyncpa [#allocation3], 1 }
  0x1b   :  { %59 = vsyncpa [#allocation4], 1 }

</bundles_post_ra>
